<compile_context>
chip_gen: v6e
topology: v6e:2x2x1
jax: 0.10.0
libtpu: 0.0.40
codegen_flags: <defaults>
</compile_context>

<pallas_src>
import functools

import jax
import jax.numpy as jnp
from jax.experimental import pallas as pl
from jax.experimental.pallas import tpu as pltpu


# ---------------------------------------------------------------------------
# Fused Pallas kernel: conv stack + global_add_pool + MLP head (one launch)
# ---------------------------------------------------------------------------
def _fused_forward_kernel(a_ref, x_ref, p_ref,
                          wc_ref, bc_ref, wm_ref, bm_ref, o_ref,
                          *, n_conv, n_lin):
    # Every operand is a single VMEM-resident block (small, padded problem).
    a = a_ref[...]                                      # bf16 [Np, Np]
    h = x_ref[...]                                      # bf16 [Np, Dp]

    # ---- GCN conv stack: h = A_norm @ (h @ W_l) + b_l, ReLU between layers
    for li in range(n_conv):                            # static -> unrolled
        w = wc_ref[li]                                  # bf16 [Dp, Dp]
        b = bc_ref[li]                                  # f32  [1, Dp]
        xw = jnp.dot(h, w, preferred_element_type=jnp.float32)
        agg = jnp.dot(a, xw.astype(jnp.bfloat16),
                      preferred_element_type=jnp.float32)
        hf = agg + b                                    # f32 epilogue
        if li < n_conv - 1:
            hf = jnp.maximum(hf, 0.0)
        h = hf.astype(jnp.bfloat16)
        # TODO(synk): dropout is a no-op here (eval mode / dropout=0.0)

    # ---- global_add_pool as a 0/1 graph-membership matmul ------------------
    # TODO(synk): replace with a segment-sum over contiguous per-graph node
    # ranges (scalar-prefetched offsets) at batch scale.
    p = p_ref[...]                                      # bf16 [Gp, Np]
    pooled = jnp.dot(p, h, preferred_element_type=jnp.float32)   # f32 [Gp, Dp]

    # ---- MLP head (BatchNorm == identity in eval; plain Linear last) -------
    out = pooled
    for li in range(n_lin):
        w = wm_ref[li]                                  # bf16 [Dp, Dp]
        b = bm_ref[li]                                  # f32  [1, Dp]
        z = jnp.dot(out.astype(jnp.bfloat16), w,
                    preferred_element_type=jnp.float32)
        z = z + b
        if li < n_lin - 1:
            z = jnp.maximum(z, 0.0)
        out = z

    o_ref[...] = out.astype(o_ref.dtype)


def _full_spec(shape):
    # Single-block spec: whole (small, padded) array lives in VMEM at step 0.
    return pl.BlockSpec(shape, lambda i: (0,) * len(shape))


def fused_gnn_forward(a_bf, x_bf, p_bf, wc, bc, wm, bm):
    """One pallas_call for the entire forward pass (7 consolidated inputs)."""
    n_conv = wc.shape[0]
    n_lin = wm.shape[0]
    n_pad = a_bf.shape[0]
    d_pad = x_bf.shape[1]
    g_pad = p_bf.shape[0]

    # Advisory cost estimate so XLA schedules the call against the host-side
    # adjacency build instead of treating it as opaque.
    flops = 2 * (n_conv * (n_pad * d_pad * d_pad + n_pad * n_pad * d_pad)
                 + g_pad * n_pad * d_pad
                 + n_lin * g_pad * d_pad * d_pad)
    bytes_in = sum(int(arr.size) * arr.dtype.itemsize
                   for arr in (a_bf, x_bf, p_bf, wc, bc, wm, bm))
    bytes_out = g_pad * d_pad * 4
    cost = pl.CostEstimate(flops=flops, transcendentals=0,
                           bytes_accessed=bytes_in + bytes_out)

    kernel = functools.partial(_fused_forward_kernel,
                               n_conv=n_conv, n_lin=n_lin)

    return pl.pallas_call(
        kernel,
        out_shape=jax.ShapeDtypeStruct((g_pad, d_pad), jnp.float32),
        grid=(1,),
        in_specs=[_full_spec(a_bf.shape), _full_spec(x_bf.shape),
                  _full_spec(p_bf.shape), _full_spec(wc.shape),
                  _full_spec(bc.shape), _full_spec(wm.shape),
                  _full_spec(bm.shape)],
        out_specs=_full_spec((g_pad, d_pad)),
        compiler_params=pltpu.CompilerParams(
            dimension_semantics=("arbitrary",),
            vmem_limit_bytes=48 * 1024 * 1024),   # safe on v7x (64 MiB phys)
        cost_estimate=cost,
    )(a_bf, x_bf, p_bf, wc, bc, wm, bm)


# ---------------------------------------------------------------------------
# Glue: padded adjacency / pooling builders, parameter stacking, init
# ---------------------------------------------------------------------------
def _round_up(x, m):
    return ((x + m - 1) // m) * m


def build_gcn_adjacency_padded(edge_index, edge_weight, num_nodes, n_pad):
    """D^{-1/2}(A_w + I)D^{-1/2} built directly into a [n_pad, n_pad] bf16
    buffer.  A_w[dst, src] = edge_weight (GCNConv convention).  Padded
    rows/cols have degree 0 -> scaled to exact zeros."""
    src = edge_index[0]
    dst = edge_index[1]
    a = jnp.zeros((n_pad, n_pad), dtype=jnp.float32)
    a = a.at[dst, src].add(edge_weight.astype(jnp.float32))
    diag = jnp.arange(num_nodes)
    a = a.at[diag, diag].add(1.0)                       # add_self_loops, fill=1.0
    deg = a.sum(axis=1)
    # NOTE: deg <= 0 (possible with negative edge weights) is zeroed here,
    # whereas PyG would propagate NaN/garbage.
    dinv = jnp.where(deg > 0, jax.lax.rsqrt(deg), 0.0)
    # normalize + bf16 cast fuse into one O(n_pad^2) pass under jit.
    return (dinv[:, None] * a * dinv[None, :]).astype(jnp.bfloat16)


def build_pool_matrix_padded(batch, num_nodes, num_graphs, n_pad, g_pad):
    batch_pad = jnp.full((n_pad,), -1, jnp.int32).at[:num_nodes].set(
        batch.astype(jnp.int32))
    return (batch_pad[None, :] ==
            jnp.arange(g_pad, dtype=jnp.int32)[:, None]).astype(jnp.bfloat16)


def _stack_layer_params(wb_list, d_pad):
    """Stack per-layer (W, b) into one bf16 [L, Dp, Dp] and one f32 [L, 1, Dp]."""
    ws, bs = [], []
    for w, b in wb_list:
        di, do = w.shape
        ws.append(jnp.zeros((d_pad, d_pad), jnp.bfloat16)
                  .at[:di, :do].set(w.astype(jnp.bfloat16)))
        bs.append(jnp.zeros((1, d_pad), jnp.float32).at[:, :do].set(b))
    return jnp.stack(ws), jnp.stack(bs)


def glorot(key, shape):
    fan_in, fan_out = shape
    limit = jnp.sqrt(6.0 / (fan_in + fan_out))
    return jax.random.uniform(key, shape, jnp.float32, -limit, limit)


def init_params(key, dim_in, dim_h_conv, dim_h_lin, dim_out,
                num_layers_conv, num_layers_lin):
    params = {"conv": [], "mlp": []}
    keys = jax.random.split(key, num_layers_conv + num_layers_lin)
    k_idx = 0
    dims = [dim_in] + [dim_h_conv] * num_layers_conv
    for li in range(num_layers_conv):
        w = glorot(keys[k_idx], (dims[li], dims[li + 1]))
        b = jnp.zeros((1, dims[li + 1]), jnp.float32)
        params["conv"].append((w, b))
        k_idx += 1
    mdims = [dim_h_conv] + [dim_h_lin] * (num_layers_lin - 1) + [dim_out]
    for li in range(num_layers_lin):
        w = glorot(keys[k_idx], (mdims[li], mdims[li + 1]))
        b = jnp.zeros((1, mdims[li + 1]), jnp.float32)
        params["mlp"].append((w, b))
        k_idx += 1
    return params


@functools.partial(jax.jit, static_argnames=("num_graphs",))
def gnn_baselines_forward(params, x, edge_index, edge_attr, batch, num_graphs):
    n, dim_in = x.shape
    dim_out = params["mlp"][-1][0].shape[1]

    # Common padded feature width (lane-dense) shared by every layer so the
    # per-layer weights can be stacked into a single input array.
    all_dims = ([dim_in, dim_out]
                + [w.shape[1] for (w, _) in params["conv"]]
                + [w.shape[1] for (w, _) in params["mlp"]])
    d_pad = _round_up(max(all_dims), 128)
    n_pad = _round_up(n, 128)
    g_pad = _round_up(num_graphs, 16)

    edge_weight = edge_attr[:, 0]
    a_bf = build_gcn_adjacency_padded(edge_index, edge_weight, n, n_pad)
    p_bf = build_pool_matrix_padded(batch, n, num_graphs, n_pad, g_pad)
    x_bf = jnp.zeros((n_pad, d_pad), jnp.bfloat16).at[:n, :dim_in].set(
        x.astype(jnp.bfloat16))

    wc, bc = _stack_layer_params(params["conv"], d_pad)
    wm, bm = _stack_layer_params(params["mlp"], d_pad)

    out_padded = fused_gnn_forward(a_bf, x_bf, p_bf, wc, bc, wm, bm)
    # NOTE: padded node rows of h carry ReLU(bias) garbage after the convs;
    # A/P padded columns are zero so the pooled result and the sliced output
    # are unaffected.
    return out_padded[:num_graphs, :dim_out]


# ---------------------------------------------------------------------------
# Pure-JAX f32 reference (loose numerical sanity check; kernel uses bf16 MXU)
# ---------------------------------------------------------------------------
def reference_forward(params, x, edge_index, edge_attr, batch, num_graphs):
    n = x.shape[0]
    src, dst = edge_index[0], edge_index[1]
    a = jnp.zeros((n, n), jnp.float32)
    a = a.at[dst, src].add(edge_attr[:, 0].astype(jnp.float32))
    a = a + jnp.eye(n, dtype=jnp.float32)
    deg = a.sum(axis=1)
    dinv = jnp.where(deg > 0, jax.lax.rsqrt(deg), 0.0)
    a = dinv[:, None] * a * dinv[None, :]

    h = x.astype(jnp.float32)
    n_conv = len(params["conv"])
    for li, (w, b) in enumerate(params["conv"]):
        h = a @ (h @ w) + b
        if li < n_conv - 1:
            h = jnp.maximum(h, 0.0)
    p = (batch[None, :] == jnp.arange(num_graphs)[:, None]).astype(jnp.float32)
    out = p @ h
    n_lin = len(params["mlp"])
    for li, (w, b) in enumerate(params["mlp"]):
        out = out @ w + b
        if li < n_lin - 1:
            out = jnp.maximum(out, 0.0)
    return out


# ---------------------------------------------------------------------------
if __name__ == "__main__":
    # 2 graphs, 8 nodes each (N=16), 12 intra-graph edges per graph (E=24),
    # dim_in=4, dim_h_conv=32, dim_h_lin=32, dim_out=8, 2 conv + 2 lin layers.
    dim_in, dim_h_conv, dim_h_lin, dim_out = 4, 32, 32, 8
    num_layers_conv, num_layers_lin = 2, 2
    num_graphs, nodes_per_graph, edges_per_graph = 2, 8, 12
    n_nodes = num_graphs * nodes_per_graph
    n_edges = num_graphs * edges_per_graph

    key = jax.random.PRNGKey(0)
    kx, ks0, kd0, ks1, kd1, ka, kp = jax.random.split(key, 7)

    x = jax.random.normal(kx, (n_nodes, dim_in), jnp.float32)

    src0 = jax.random.randint(ks0, (edges_per_graph,), 0, nodes_per_graph)
    dst0 = jax.random.randint(kd0, (edges_per_graph,), 0, nodes_per_graph)
    src1 = jax.random.randint(ks1, (edges_per_graph,), nodes_per_graph, n_nodes)
    dst1 = jax.random.randint(kd1, (edges_per_graph,), nodes_per_graph, n_nodes)
    edge_index = jnp.stack(
        [jnp.concatenate([src0, src1]), jnp.concatenate([dst0, dst1])], axis=0
    ).astype(jnp.int32)

    edge_attr = jax.random.normal(ka, (n_edges, 3), jnp.float32)
    # Positive edge weights in column 0 (used by GCN symmetric normalization).
    edge_attr = edge_attr.at[:, 0].set(jnp.abs(edge_attr[:, 0]) + 0.1)

    batch = jnp.repeat(jnp.arange(num_graphs, dtype=jnp.int32), nodes_per_graph)

    params = init_params(kp, dim_in, dim_h_conv, dim_h_lin, dim_out,
                         num_layers_conv, num_layers_lin)

    out = gnn_baselines_forward(params, x, edge_index, edge_attr, batch,
                                num_graphs)
    out = jax.block_until_ready(out)

    assert out.shape == (num_graphs, dim_out)
    assert bool(jnp.all(jnp.isfinite(out)))

    # Loose tolerance: kernel uses bf16 matmul operands with f32 accumulation.
    ref = reference_forward(params, x, edge_index, edge_attr, batch, num_graphs)
    assert bool(jnp.allclose(out, ref, rtol=1e-1, atol=1e-1))

    print("KERNEL_OK")
</pallas_src>

<mosaic_0001>
module attributes {stable_mosaic.version = 11 : i64} {
  func.func private @main(%arg0: i32) attributes {dimension_semantics = [#tpu.dimension_semantics<core_parallel>], iteration_bounds = array<i64: 2>, tpu.core_type = #tpu.core_type<sc_scalar_subcore>, window_params = []} {
    return
  }
}

module attributes {stable_mosaic.version = 11 : i64} {
  func.func private @main(%arg0: i32) attributes {dimension_semantics = [#tpu.dimension_semantics<core_parallel>], iteration_bounds = array<i64: 2>, tpu.core_type = #tpu.core_type<sc_scalar_subcore>, window_params = []} {
    return
  }
}

module attributes {stable_mosaic.version = 11 : i64} {
  func.func @_fused_forward_kernel(%arg0: i32, %arg1: memref<128x128xbf16, #tpu.memory_space<vmem>>, %arg2: memref<128x128xbf16, #tpu.memory_space<vmem>>, %arg3: memref<16x128xbf16, #tpu.memory_space<vmem>>, %arg4: memref<2x128x128xbf16, #tpu.memory_space<vmem>>, %arg5: memref<2x1x128xf32, #tpu.memory_space<vmem>>, %arg6: memref<2x128x128xbf16, #tpu.memory_space<vmem>>, %arg7: memref<2x1x128xf32, #tpu.memory_space<vmem>>, %arg8: memref<16x128xf32, #tpu.memory_space<vmem>>) attributes {dimension_semantics = [#tpu.dimension_semantics<arbitrary>], iteration_bounds = array<i64: 1>, scalar_prefetch = 0 : i64, scratch_operands = 0 : i64, tpu.core_type = #tpu.core_type<tc>, window_params = [{pipeline_mode = #tpu.pipeline_mode<synchronous>, transform_indices = @transform_0, window_bounds = array<i64: 128, 128>}, {pipeline_mode = #tpu.pipeline_mode<synchronous>, transform_indices = @transform_1, window_bounds = array<i64: 128, 128>}, {pipeline_mode = #tpu.pipeline_mode<synchronous>, transform_indices = @transform_2, window_bounds = array<i64: 16, 128>}, {pipeline_mode = #tpu.pipeline_mode<synchronous>, transform_indices = @transform_3, window_bounds = array<i64: 2, 128, 128>}, {pipeline_mode = #tpu.pipeline_mode<synchronous>, transform_indices = @transform_4, window_bounds = array<i64: 2, 1, 128>}, {pipeline_mode = #tpu.pipeline_mode<synchronous>, transform_indices = @transform_5, window_bounds = array<i64: 2, 128, 128>}, {pipeline_mode = #tpu.pipeline_mode<synchronous>, transform_indices = @transform_6, window_bounds = array<i64: 2, 1, 128>}, {pipeline_mode = #tpu.pipeline_mode<synchronous>, transform_indices = @transform_7, window_bounds = array<i64: 16, 128>}]} {
    %c0 = arith.constant 0 : index
    %c0_0 = arith.constant 0 : index
    %0 = vector.load %arg1[%c0, %c0_0] : memref<128x128xbf16, #tpu.memory_space<vmem>>, vector<128x128xbf16>
    %c0_1 = arith.constant 0 : index
    %c0_2 = arith.constant 0 : index
    %1 = vector.load %arg2[%c0_1, %c0_2] : memref<128x128xbf16, #tpu.memory_space<vmem>>, vector<128x128xbf16>
    %c0_3 = arith.constant 0 : index
    %c0_4 = arith.constant 0 : index
    %c0_5 = arith.constant 0 : index
    %2 = vector.load %arg4[%c0_3, %c0_4, %c0_5] : memref<2x128x128xbf16, #tpu.memory_space<vmem>>, vector<1x128x128xbf16>
    %3 = vector.shape_cast %2 : vector<1x128x128xbf16> to vector<128x128xbf16>
    %c0_6 = arith.constant 0 : index
    %c0_7 = arith.constant 0 : index
    %c0_8 = arith.constant 0 : index
    %4 = vector.load %arg5[%c0_6, %c0_7, %c0_8] : memref<2x1x128xf32, #tpu.memory_space<vmem>>, vector<1x1x128xf32>
    %5 = vector.shape_cast %4 : vector<1x1x128xf32> to vector<1x128xf32>
    %cst = arith.constant dense<0.000000e+00> : vector<128x128xf32>
    %6 = tpu.matmul %1, %3, %cst {dimension_numbers = #tpu.dot_dimension_numbers<[1], [0], [0], [1], [0, 0, 1, 1], [], []>} : vector<128x128xbf16>, vector<128x128xbf16>, vector<128x128xf32> -> vector<128x128xf32>
    %7 = arith.truncf %6 : vector<128x128xf32> to vector<128x128xbf16>
    %cst_9 = arith.constant dense<0.000000e+00> : vector<128x128xf32>
    %8 = tpu.matmul %0, %7, %cst_9 {dimension_numbers = #tpu.dot_dimension_numbers<[1], [0], [0], [1], [0, 0, 1, 1], [], []>} : vector<128x128xbf16>, vector<128x128xbf16>, vector<128x128xf32> -> vector<128x128xf32>
    %9 = vector.broadcast %5 : vector<1x128xf32> to vector<128x128xf32>
    %10 = arith.addf %8, %9 : vector<128x128xf32>
    %cst_10 = arith.constant 0.000000e+00 : f32
    %11 = vector.broadcast %cst_10 : f32 to vector<128x128xf32>
    %12 = arith.maximumf %10, %11 : vector<128x128xf32>
    %13 = arith.truncf %12 : vector<128x128xf32> to vector<128x128xbf16>
    %c1 = arith.constant 1 : index
    %c0_11 = arith.constant 0 : index
    %c0_12 = arith.constant 0 : index
    %14 = vector.load %arg4[%c1, %c0_11, %c0_12] : memref<2x128x128xbf16, #tpu.memory_space<vmem>>, vector<1x128x128xbf16>
    %15 = vector.shape_cast %14 : vector<1x128x128xbf16> to vector<128x128xbf16>
    %c1_13 = arith.constant 1 : index
    %c0_14 = arith.constant 0 : index
    %c0_15 = arith.constant 0 : index
    %16 = vector.load %arg5[%c1_13, %c0_14, %c0_15] : memref<2x1x128xf32, #tpu.memory_space<vmem>>, vector<1x1x128xf32>
    %17 = vector.shape_cast %16 : vector<1x1x128xf32> to vector<1x128xf32>
    %cst_16 = arith.constant dense<0.000000e+00> : vector<128x128xf32>
    %18 = tpu.matmul %13, %15, %cst_16 {dimension_numbers = #tpu.dot_dimension_numbers<[1], [0], [0], [1], [0, 0, 1, 1], [], []>} : vector<128x128xbf16>, vector<128x128xbf16>, vector<128x128xf32> -> vector<128x128xf32>
    %19 = arith.truncf %18 : vector<128x128xf32> to vector<128x128xbf16>
    %cst_17 = arith.constant dense<0.000000e+00> : vector<128x128xf32>
    %20 = tpu.matmul %0, %19, %cst_17 {dimension_numbers = #tpu.dot_dimension_numbers<[1], [0], [0], [1], [0, 0, 1, 1], [], []>} : vector<128x128xbf16>, vector<128x128xbf16>, vector<128x128xf32> -> vector<128x128xf32>
    %21 = vector.broadcast %17 : vector<1x128xf32> to vector<128x128xf32>
    %22 = arith.addf %20, %21 : vector<128x128xf32>
    %23 = arith.truncf %22 : vector<128x128xf32> to vector<128x128xbf16>
    %c0_18 = arith.constant 0 : index
    %c0_19 = arith.constant 0 : index
    %24 = vector.load %arg3[%c0_18, %c0_19] : memref<16x128xbf16, #tpu.memory_space<vmem>>, vector<16x128xbf16>
    %cst_20 = arith.constant dense<0.000000e+00> : vector<16x128xf32>
    %25 = tpu.matmul %24, %23, %cst_20 {dimension_numbers = #tpu.dot_dimension_numbers<[1], [0], [0], [1], [0, 0, 1, 1], [], []>} : vector<16x128xbf16>, vector<128x128xbf16>, vector<16x128xf32> -> vector<16x128xf32>
    %c0_21 = arith.constant 0 : index
    %c0_22 = arith.constant 0 : index
    %c0_23 = arith.constant 0 : index
    %26 = vector.load %arg6[%c0_21, %c0_22, %c0_23] : memref<2x128x128xbf16, #tpu.memory_space<vmem>>, vector<1x128x128xbf16>
    %27 = vector.shape_cast %26 : vector<1x128x128xbf16> to vector<128x128xbf16>
    %c0_24 = arith.constant 0 : index
    %c0_25 = arith.constant 0 : index
    %c0_26 = arith.constant 0 : index
    %28 = vector.load %arg7[%c0_24, %c0_25, %c0_26] : memref<2x1x128xf32, #tpu.memory_space<vmem>>, vector<1x1x128xf32>
    %29 = vector.shape_cast %28 : vector<1x1x128xf32> to vector<1x128xf32>
    %30 = arith.truncf %25 : vector<16x128xf32> to vector<16x128xbf16>
    %cst_27 = arith.constant dense<0.000000e+00> : vector<16x128xf32>
    %31 = tpu.matmul %30, %27, %cst_27 {dimension_numbers = #tpu.dot_dimension_numbers<[1], [0], [0], [1], [0, 0, 1, 1], [], []>} : vector<16x128xbf16>, vector<128x128xbf16>, vector<16x128xf32> -> vector<16x128xf32>
    %32 = vector.broadcast %29 : vector<1x128xf32> to vector<16x128xf32>
    %33 = arith.addf %31, %32 : vector<16x128xf32>
    %cst_28 = arith.constant 0.000000e+00 : f32
    %34 = vector.broadcast %cst_28 : f32 to vector<16x128xf32>
    %35 = arith.maximumf %33, %34 : vector<16x128xf32>
    %c1_29 = arith.constant 1 : index
    %c0_30 = arith.constant 0 : index
    %c0_31 = arith.constant 0 : index
    %36 = vector.load %arg6[%c1_29, %c0_30, %c0_31] : memref<2x128x128xbf16, #tpu.memory_space<vmem>>, vector<1x128x128xbf16>
    %37 = vector.shape_cast %36 : vector<1x128x128xbf16> to vector<128x128xbf16>
    %c1_32 = arith.constant 1 : index
    %c0_33 = arith.constant 0 : index
    %c0_34 = arith.constant 0 : index
    %38 = vector.load %arg7[%c1_32, %c0_33, %c0_34] : memref<2x1x128xf32, #tpu.memory_space<vmem>>, vector<1x1x128xf32>
    %39 = vector.shape_cast %38 : vector<1x1x128xf32> to vector<1x128xf32>
    %40 = arith.truncf %35 : vector<16x128xf32> to vector<16x128xbf16>
    %cst_35 = arith.constant dense<0.000000e+00> : vector<16x128xf32>
    %41 = tpu.matmul %40, %37, %cst_35 {dimension_numbers = #tpu.dot_dimension_numbers<[1], [0], [0], [1], [0, 0, 1, 1], [], []>} : vector<16x128xbf16>, vector<128x128xbf16>, vector<16x128xf32> -> vector<16x128xf32>
    %42 = vector.broadcast %39 : vector<1x128xf32> to vector<16x128xf32>
    %43 = arith.addf %41, %42 : vector<16x128xf32>
    %c0_36 = arith.constant 0 : index
    %c0_37 = arith.constant 0 : index
    %44 = vector.load %arg8[%c0_36, %c0_37] : memref<16x128xf32, #tpu.memory_space<vmem>>, vector<16x128xf32>
    tpu.vector_store %arg8[%c0_36, %c0_37], %43 {strides = array<i32>} : memref<16x128xf32, #tpu.memory_space<vmem>>, vector<16x128xf32>,
    return
  }
  func.func @transform_0(%arg0: i32) -> (i32, i32) {
    %c0_i32 = arith.constant 0 : i32
    %c0_i32_0 = arith.constant 0 : i32
    %c0_i32_1 = arith.constant 0 : i32
    return %c0_i32, %c0_i32_0 : i32, i32
  }
  func.func @transform_1(%arg0: i32) -> (i32, i32) {
    %c0_i32 = arith.constant 0 : i32
    %c0_i32_0 = arith.constant 0 : i32
    %c0_i32_1 = arith.constant 0 : i32
    return %c0_i32, %c0_i32_0 : i32, i32
  }
  func.func @transform_2(%arg0: i32) -> (i32, i32) {
    %c0_i32 = arith.constant 0 : i32
    %c0_i32_0 = arith.constant 0 : i32
    %c0_i32_1 = arith.constant 0 : i32
    return %c0_i32, %c0_i32_0 : i32, i32
  }
  func.func @transform_3(%arg0: i32) -> (i32, i32, i32) {
    %c0_i32 = arith.constant 0 : i32
    %c0_i32_0 = arith.constant 0 : i32
    %c0_i32_1 = arith.constant 0 : i32
    %c0_i32_2 = arith.constant 0 : i32
    return %c0_i32, %c0_i32_0, %c0_i32_1 : i32, i32, i32
  }
  func.func @transform_4(%arg0: i32) -> (i32, i32, i32) {
    %c0_i32 = arith.constant 0 : i32
    %c0_i32_0 = arith.constant 0 : i32
    %c0_i32_1 = arith.constant 0 : i32
    %c0_i32_2 = arith.constant 0 : i32
    return %c0_i32, %c0_i32_0, %c0_i32_1 : i32, i32, i32
  }
  func.func @transform_5(%arg0: i32) -> (i32, i32, i32) {
    %c0_i32 = arith.constant 0 : i32
    %c0_i32_0 = arith.constant 0 : i32
    %c0_i32_1 = arith.constant 0 : i32
    %c0_i32_2 = arith.constant 0 : i32
    return %c0_i32, %c0_i32_0, %c0_i32_1 : i32, i32, i32
  }
  func.func @transform_6(%arg0: i32) -> (i32, i32, i32) {
    %c0_i32 = arith.constant 0 : i32
    %c0_i32_0 = arith.constant 0 : i32
    %c0_i32_1 = arith.constant 0 : i32
    %c0_i32_2 = arith.constant 0 : i32
    return %c0_i32, %c0_i32_0, %c0_i32_1 : i32, i32, i32
  }
  func.func @transform_7(%arg0: i32) -> (i32, i32) {
    %c0_i32 = arith.constant 0 : i32
    %c0_i32_0 = arith.constant 0 : i32
    %c0_i32_1 = arith.constant 0 : i32
    return %c0_i32, %c0_i32_0 : i32, i32
  }
}

</mosaic_0001>

<bundles_post_ra>
// kernel: gnn_baselines_forward.1
= control target key start
LH: loop header
LB: loop body
LE: loop exit
PB: predicated region body
PF: predicated region fallthrough
CT: control target
= control target key end

     0   :  { %vm1438_vm0 = vmmov 0   ;;  %s1706_s3 = inlined_call_operand.vmem [shape: bf16[2,128,128], index: 3, kind: input, shape index: {}]   ;;  %s1707_s1 = inlined_call_operand.vmem [shape: bf16[128,128], index: 1, kind: input, shape index: {}]   ;;  %s1708_s0 = inlined_call_operand.vmem [shape: bf16[128,128], index: 0, kind: input, shape index: {}]   ;;  %s1709_s4 = inlined_call_operand.vmem [shape: f32[2,1,128], index: 4, kind: input, shape index: {}]   ;;  %s1710_s2 = inlined_call_operand.vmem [shape: bf16[16,128], index: 2, kind: input, shape index: {}]   ;;  %s1711_s5 = inlined_call_operand.vmem [shape: bf16[2,128,128], index: 5, kind: input, shape index: {}]   ;;  %s1712_s6 = inlined_call_operand.vmem [shape: f32[2,1,128], index: 6, kind: input, shape index: {}]   ;;  %s1713_s7 = inlined_call_operand.vmem [shape: f32[16,128], index: 7, kind: output, shape index: {}]  }
   0x1   :  { %v1388_v0 = vld [vmem:[%s1706_s3 + $0x38] sm:$0xff]   ;;  %v1389_v1 = vld [vmem:[%s1706_s3 + $0x30] sm:$0xff]   ;;  %v1390_v2 = vld [vmem:[%s1706_s3 + $0x28] sm:$0xff]  }
   0x2   :  { %1198 = vmatprep.subr.bf16.mxu0 %v1388_v0  ;;  %v1391_v3 = vld [vmem:[%s1706_s3 + $0x20] sm:$0xff]   ;;  %v1392_v5 = vld [vmem:[%s1706_s3 + $0x18] sm:$0xff]   ;;  %v1393_v6 = vld [vmem:[%s1706_s3 + $0x10] sm:$0xff]  }
   0x3   :  { %1199 = vmatpush3.bf16.msra.mxu0 %v1388_v0  ;;  %v1396_v4 = vld [vmem:[%s1707_s1] sm:$0xff]   ;;  %v1394_v7 = vld [vmem:[%s1706_s3 + $0x8] sm:$0xff]   ;;  %v1398_v10 = vld [vmem:[%s1707_s1 + $0x10] sm:$0xff]  }
   0x4   :  { %1200 = vmatprep.subr.bf16.mxu0 %v1389_v1  ;;  %1214 = vmatprep.mubr.bf16.mxu0 %v1396_v4  ;;  %v1395_v8 = vld [vmem:[%s1706_s3] sm:$0xff]   ;;  %v1397_v9 = vld [vmem:[%s1707_s1 + $0x8] sm:$0xff]   ;;  %v1399_v11 = vld [vmem:[%s1707_s1 + $0x18] sm:$0xff]  }
   0x5   :  { %v1400_v12 = vld [vmem:[%s1707_s1 + $0x20] sm:$0xff]   ;;  %v1401_v13 = vld [vmem:[%s1707_s1 + $0x28] sm:$0xff]   ;;  %v1402_v14 = vld [vmem:[%s1707_s1 + $0x30] sm:$0xff]  }
   0x6   :  { %v1403_v15 = vld [vmem:[%s1707_s1 + $0x38] sm:$0xff]   ;;  %v1530_v16 = vld [vmem:[%s1708_s0] sm:$0xff]   ;;  %v1413_v18 = vld [vmem:[%s1706_s3 + $0x70] sm:$0xff]  }
   0x7   :  { %1201 = vmatpush3.bf16.msra.mxu0 %v1389_v1  ;;  %1246 = vmatprep.mubr.bf16.mxu1 %v1530_v16  ;;  %v1412_v17 = vld [vmem:[%s1706_s3 + $0x78] sm:$0xff]   ;;  %v1414_v19 = vld [vmem:[%s1706_s3 + $0x68] sm:$0xff]   ;;  %v1415_v20 = vld [vmem:[%s1706_s3 + $0x60] sm:$0xff]  }
   0x8   :  { %1202 = vmatprep.subr.bf16.mxu0 %v1390_v2  ;;  %v1416_v21 = vld [vmem:[%s1706_s3 + $0x58] sm:$0xff]   ;;  %v1551_v46 = vld [vmem:[%s1708_s0 + $0x8] sm:$0xff]   ;;  %v1556_v47 = vld [vmem:[%s1708_s0 + $0x10] sm:$0xff]  }
   0x9   :  { %v1563_v48 = vld [vmem:[%s1708_s0 + $0x18] sm:$0xff]   ;;  %v1568_v49 = vld [vmem:[%s1708_s0 + $0x20] sm:$0xff]   ;;  %v1575_v50 = vld [vmem:[%s1708_s0 + $0x28] sm:$0xff]  }
   0xa   :  { %v1580_v51 = vld [vmem:[%s1708_s0 + $0x30] sm:$0xff]   ;;  %v1587_v52 = vld [vmem:[%s1708_s0 + $0x38] sm:$0xff]   ;;  %v1418_v54 = vld [vmem:[%s1706_s3 + $0x48] sm:$0xff]  }
   0xb   :  { %1203 = vmatpush3.bf16.msra.mxu0 %v1390_v2  ;;  %v1417_v53 = vld [vmem:[%s1706_s3 + $0x50] sm:$0xff]   ;;  %v1419_v55 = vld [vmem:[%s1706_s3 + $0x40] sm:$0xff]  }
   0xc   :  { %1204 = vmatprep.subr.bf16.mxu0 %v1391_v3  ;;  %v1036_v58 = vld [vmem:[%s1709_s4] ss:$0 sm:$0xff] }
   0xf   :  { %1205 = vmatpush3.bf16.msra.mxu0 %v1391_v3 }
  0x10   :  { %1206 = vmatprep.subr.bf16.mxu0 %v1392_v5 }
  0x13   :  { %1207 = vmatpush3.bf16.msra.mxu0 %v1392_v5 }
  0x14   :  { %1208 = vmatprep.subr.bf16.mxu0 %v1393_v6 }
  0x17   :  { %1209 = vmatpush3.bf16.msra.mxu0 %v1393_v6 }
  0x18   :  { %1210 = vmatprep.subr.bf16.mxu0 %v1394_v7 }
  0x1b   :  { %1211 = vmatpush3.bf16.msra.mxu0 %v1394_v7 }
  0x1c   :  { %1212 = vmatprep.subr.bf16.mxu0 %v1395_v8 }
  0x1f   :  { %1213 = vmatpush3.bf16.msra.mxu0 %v1395_v8 }
  0x20   :  { %1262 = vmatprep.subr.bf16.mxu0 %v1412_v17 }
  0x22   :  { %1215 = vmatmul.mubr.bf16.vlgmr.msra.gmra.mxu0 %v1397_v9 }
  0x23   :  { %1218 = vmatprep.mubr.bf16.mxu0 %v1398_v10  ;;  %1263 = vmatpush3.bf16.msra.mxu0 %v1412_v17 }
  0x24   :  { %1264 = vmatprep.subr.bf16.mxu0 %v1413_v18 }
  0x27   :  { %1265 = vmatpush3.bf16.msra.mxu0 %v1413_v18 }
  0x28   :  { %1266 = vmatprep.subr.bf16.mxu0 %v1414_v19 }
  0x2a   :  { %1219 = vmatmul.mubr.bf16.gmra.mxu0 %v1399_v11 }
  0x2b   :  { %1222 = vmatprep.mubr.bf16.mxu0 %v1400_v12  ;;  %1267 = vmatpush3.bf16.msra.mxu0 %v1414_v19 }
  0x2c   :  { %1268 = vmatprep.subr.bf16.mxu0 %v1415_v20 }
  0x2f   :  { %1269 = vmatpush3.bf16.msra.mxu0 %v1415_v20 }
  0x30   :  { %1270 = vmatprep.subr.bf16.mxu0 %v1416_v21 }
  0x32   :  { %1223 = vmatmul.mubr.bf16.gmra.mxu0 %v1401_v13 }
  0x33   :  { %1226 = vmatprep.mubr.bf16.mxu0 %v1402_v14  ;;  %1271 = vmatpush3.bf16.msra.mxu0 %v1416_v21 }
  0x34   :  { %1272 = vmatprep.subr.bf16.mxu0 %v1417_v53 }
  0x37   :  { %1273 = vmatpush3.bf16.msra.mxu0 %v1417_v53 }
  0x38   :  { %1274 = vmatprep.subr.bf16.mxu0 %v1418_v54 }
  0x3a   :  { %1227 = vmatmul.mubr.bf16.gmra.mxu0 %v1403_v15 }
  0x3b   :  { %1275 = vmatpush3.bf16.msra.mxu0 %v1418_v54 }
  0x3c   :  { %1276 = vmatprep.subr.bf16.mxu0 %v1419_v55 }
  0x3f   :  { %1277 = vmatpush3.bf16.msra.mxu0 %v1419_v55 }
  0xe2   :  { %v1216_v22 = vpop.f32.mrf.mxu0 }
  0xe4   :  { %v206_v23 = vpop.f32.mrf.mxu0 }
  0xe6   :  { %v1217_v24 = vpop.f32.mrf.mxu0 }
  0xe7   :  { %v270_v44 = vpack.c.bf16 %v1217_v24, %v1216_v22 }
  0xe8   :  { %v209_v25 = vpop.f32.mrf.mxu0 }
  0xe9   :  { %v269_v45 = vpack.c.bf16 %v209_v25, %v206_v23 }
  0xea   :  { %v1220_v26 = vpop.f32.mrf.mxu0 }
  0xec   :  { %v222_v27 = vpop.f32.mrf.mxu0 }
  0xee   :  { %v1221_v28 = vpop.f32.mrf.mxu0 }
  0xef   :  { %v272_v42 = vpack.c.bf16 %v1221_v28, %v1220_v26 }
  0xf0   :  { %v225_v29 = vpop.f32.mrf.mxu0 }
  0xf1   :  { %v271_v43 = vpack.c.bf16 %v225_v29, %v222_v27 }
  0xf2   :  { %v1224_v30 = vpop.f32.mrf.mxu0 }
  0xf4   :  { %v238_v31 = vpop.f32.mrf.mxu0 }
  0xf6   :  { %v1225_v32 = vpop.f32.mrf.mxu0 }
  0xf7   :  { %v274_v40 = vpack.c.bf16 %v1225_v32, %v1224_v30 }
  0xf8   :  { %v241_v33 = vpop.f32.mrf.mxu0 }
  0xf9   :  { %v273_v41 = vpack.c.bf16 %v241_v33, %v238_v31 }
  0xfa   :  { %v1228_v34 = vpop.f32.mrf.mxu0 }
  0xfc   :  { %v254_v35 = vpop.f32.mrf.mxu0 }
  0xfe   :  { %v1229_v36 = vpop.f32.mrf.mxu0 }
  0xff   :  { %v276_v37 = vpack.c.bf16 %v1229_v36, %v1228_v34 }
 0x100   :  { %v257_v38 = vpop.f32.mrf.mxu0 }
 0x101   :  { %v275_v39 = vpack.c.bf16 %v257_v38, %v254_v35  ;;  %1230 = vmatprep.subr.bf16.mxu1 %v276_v37 }
 0x102   :  { %1231 = vmatpush3.bf16.msra.mxu1 %v276_v37 }
 0x103   :  { %1232 = vmatprep.subr.bf16.mxu1 %v275_v39 }
 0x106   :  { %1233 = vmatpush3.bf16.msra.mxu1 %v275_v39 }
 0x107   :  { %1234 = vmatprep.subr.bf16.mxu1 %v274_v40 }
 0x10a   :  { %1235 = vmatpush3.bf16.msra.mxu1 %v274_v40 }
 0x10b   :  { %1236 = vmatprep.subr.bf16.mxu1 %v273_v41 }
 0x10e   :  { %1237 = vmatpush3.bf16.msra.mxu1 %v273_v41 }
 0x10f   :  { %1238 = vmatprep.subr.bf16.mxu1 %v272_v42 }
 0x112   :  { %1239 = vmatpush3.bf16.msra.mxu1 %v272_v42 }
 0x113   :  { %1240 = vmatprep.subr.bf16.mxu1 %v271_v43 }
 0x116   :  { %1241 = vmatpush3.bf16.msra.mxu1 %v271_v43 }
 0x117   :  { %1242 = vmatprep.subr.bf16.mxu1 %v270_v44 }
 0x11a   :  { %1243 = vmatpush3.bf16.msra.mxu1 %v270_v44 }
 0x11b   :  { %1244 = vmatprep.subr.bf16.mxu1 %v269_v45 }
 0x11e   :  { %1245 = vmatpush3.bf16.msra.mxu1 %v269_v45 }
 0x121   :  { %1247 = vmatmul.mubr.bf16.vlgmr.msra.gmra.mxu1 %v1551_v46 }
 0x122   :  { %1250 = vmatprep.mubr.bf16.mxu1 %v1556_v47 }
 0x129   :  { %1251 = vmatmul.mubr.bf16.gmra.mxu1 %v1563_v48 }
 0x12a   :  { %1254 = vmatprep.mubr.bf16.mxu1 %v1568_v49 }
 0x131   :  { %1255 = vmatmul.mubr.bf16.gmra.mxu1 %v1575_v50 }
 0x132   :  { %1258 = vmatprep.mubr.bf16.mxu1 %v1580_v51 }
 0x139   :  { %1259 = vmatmul.mubr.bf16.gmra.mxu1 %v1587_v52 }
 0x13a   :  { %1310 = vmatprep.mubr.bf16.mxu1 %v1530_v16 }
 0x1e1   :  { %v1248_v56 = vpop.f32.mrf.mxu1 }
 0x1e2   :  { %v374_v62 = vadd.f32 %v1248_v56, %v1036_v58 }
 0x1e3   :  { %v365_v57 = vpop.f32.mrf.mxu1 }
 0x1e4   :  { %v366_v60 = vadd.f32 %v1036_v58, %v365_v57  ;;  %v430_v5 = vmax.f32 %v374_v62, 0.0 }
 0x1e5   :  { %v1249_v59 = vpop.f32.mrf.mxu1 }
 0x1e6   :  { %v377_v61 = vadd.f32 %v1249_v59, %v1036_v58  ;;  %v428_v3 = vmax.f32 %v366_v60, 0.0 }
 0x1e7   :  { %v368_v63 = vpop.f32.mrf.mxu1 }
 0x1e8   :  { %v369_v0 = vadd.f32 %v1036_v58, %v368_v63  ;;  %v431_v1 = vmax.f32 %v377_v61, 0.0 }
 0x1e9   :  { %v1252_v2 = vpop.f32.mrf.mxu1 }
 0x1ea   :  { %v429_v4 = vmax.f32 %v369_v0, 0.0  ;;  %v445_v8 = vpack.c.bf16 %v431_v1, %v430_v5  ;;  %v390_v12 = vadd.f32 %v1252_v2, %v1036_v58 }
 0x1eb   :  { %v381_v6 = vpop.f32.mrf.mxu1 }
 0x1ec   :  { %v444_v7 = vpack.c.bf16 %v429_v4, %v428_v3  ;;  %v382_v10 = vadd.f32 %v1036_v58, %v381_v6  ;;  %v434_v19 = vmax.f32 %v390_v12, 0.0 }
 0x1ed   :  { %v1253_v9 = vpop.f32.mrf.mxu1 }
 0x1ee   :  { %v393_v11 = vadd.f32 %v1253_v9, %v1036_v58  ;;  %1278 = vmatprep.mubr.bf16.mxu0 %v444_v7  ;;  %v432_v17 = vmax.f32 %v382_v10, 0.0 }
 0x1ef   :  { %v384_v13 = vpop.f32.mrf.mxu1  ;;  %1279 = vmatmul.mubr.bf16.vlgmr.msra.gmra.mxu0 %v445_v8 }
 0x1f0   :  { %v385_v14 = vadd.f32 %v1036_v58, %v384_v13  ;;  %v435_v15 = vmax.f32 %v393_v11, 0.0 }
 0x1f1   :  { %v1256_v16 = vpop.f32.mrf.mxu1 }
 0x1f2   :  { %v433_v18 = vmax.f32 %v385_v14, 0.0  ;;  %v447_v22 = vpack.c.bf16 %v435_v15, %v434_v19  ;;  %v406_v26 = vadd.f32 %v1256_v16, %v1036_v58  ;;  %v1437_v16 = vmov 0.0  }
 0x1f3   :  { %v397_v20 = vpop.f32.mrf.mxu1  ;;  %1326 = vmatprep.subr.bf16.mxu0 %v1437_v16 }
 0x1f4   :  { %v446_v21 = vpack.c.bf16 %v433_v18, %v432_v17  ;;  %v398_v24 = vadd.f32 %v1036_v58, %v397_v20  ;;  %v438_v33 = vmax.f32 %v406_v26, 0.0 }
 0x1f5   :  { %v1257_v23 = vpop.f32.mrf.mxu1 }
 0x1f6   :  { %v409_v25 = vadd.f32 %v1257_v23, %v1036_v58  ;;  %1282 = vmatprep.mubr.bf16.mxu0 %v446_v21  ;;  %v436_v31 = vmax.f32 %v398_v24, 0.0 }
 0x1f7   :  { %v400_v27 = vpop.f32.mrf.mxu1  ;;  %1283 = vmatmul.mubr.bf16.gmra.mxu0 %v447_v22 }
 0x1f8   :  { %v401_v28 = vadd.f32 %v1036_v58, %v400_v27  ;;  %v439_v29 = vmax.f32 %v409_v25, 0.0 }
 0x1f9   :  { %v1260_v30 = vpop.f32.mrf.mxu1 }
 0x1fa   :  { %v437_v32 = vmax.f32 %v401_v28, 0.0  ;;  %v449_v36 = vpack.c.bf16 %v439_v29, %v438_v33  ;;  %v422_v40 = vadd.f32 %v1260_v30, %v1036_v58  ;;  %v1070_v30 = vld [vmem:[%s1709_s4 + $0x1] ss:$0 sm:$0xff] }
 0x1fb   :  { %v413_v34 = vpop.f32.mrf.mxu1 }
 0x1fc   :  { %v448_v35 = vpack.c.bf16 %v437_v32, %v436_v31  ;;  %v414_v38 = vadd.f32 %v1036_v58, %v413_v34  ;;  %v442_v53 = vmax.f32 %v422_v40, 0.0 }
 0x1fd   :  { %v1261_v37 = vpop.f32.mrf.mxu1 }
 0x1fe   :  { %v425_v39 = vadd.f32 %v1261_v37, %v1036_v58  ;;  %1286 = vmatprep.mubr.bf16.mxu0 %v448_v35  ;;  %v440_v44 = vmax.f32 %v414_v38, 0.0 }
 0x1ff   :  { %v416_v41 = vpop.f32.mrf.mxu1  ;;  %1287 = vmatmul.mubr.bf16.gmra.mxu0 %v449_v36 }
 0x200   :  { %v417_v42 = vadd.f32 %v1036_v58, %v416_v41  ;;  %v443_v43 = vmax.f32 %v425_v39, 0.0 }
 0x202   :  { %v441_v45 = vmax.f32 %v417_v42, 0.0  ;;  %v451_v55 = vpack.c.bf16 %v443_v43, %v442_v53 }
 0x204   :  { %v450_v54 = vpack.c.bf16 %v441_v45, %v440_v44 }
 0x206   :  { %1290 = vmatprep.mubr.bf16.mxu0 %v450_v54 }
 0x207   :  { %1291 = vmatmul.mubr.bf16.gmra.mxu0 %v451_v55 }
 0x208   :  { %1342 = vmatprep.mubr.msk.bf16.mxu0 %vm1438_vm0, %v1437_v16 }
 0x2af   :  { %v1280_v56 = vpop.f32.mrf.mxu0 }
 0x2b1   :  { %v553_v57 = vpop.f32.mrf.mxu0 }
 0x2b3   :  { %v1281_v59 = vpop.f32.mrf.mxu0 }
 0x2b4   :  { %v617_v14 = vpack.c.bf16 %v1281_v59, %v1280_v56 }
 0x2b5   :  { %v556_v60 = vpop.f32.mrf.mxu0 }
 0x2b6   :  { %v616_v15 = vpack.c.bf16 %v556_v60, %v553_v57 }
 0x2b7   :  { %v1284_v61 = vpop.f32.mrf.mxu0 }
 0x2b9   :  { %v569_v62 = vpop.f32.mrf.mxu0 }
 0x2bb   :  { %v1285_v63 = vpop.f32.mrf.mxu0 }
 0x2bc   :  { %v619_v12 = vpack.c.bf16 %v1285_v63, %v1284_v61 }
 0x2bd   :  { %v572_v0 = vpop.f32.mrf.mxu0 }
 0x2be   :  { %v618_v13 = vpack.c.bf16 %v572_v0, %v569_v62 }
 0x2bf   :  { %v1288_v1 = vpop.f32.mrf.mxu0 }
 0x2c1   :  { %v585_v2 = vpop.f32.mrf.mxu0 }
 0x2c3   :  { %v1289_v3 = vpop.f32.mrf.mxu0 }
 0x2c4   :  { %v621_v10 = vpack.c.bf16 %v1289_v3, %v1288_v1  ;;  %v1420_v1 = vld [vmem:[%s1710_s2] sm:$0xff]  }
 0x2c5   :  { %v588_v58 = vpop.f32.mrf.mxu0  ;;  %v1428_v3 = vld [vmem:[%s1711_s5] sm:$0xff]  }
 0x2c6   :  { %v620_v11 = vpack.c.bf16 %v588_v58, %v585_v2  ;;  %v1427_v2 = vld [vmem:[%s1711_s5 + $0x8] sm:$0xff]   ;;  %v1429_v58 = vld [vmem:[%s1711_s5 + $0x78] sm:$0xff]  }
 0x2c7   :  { %v1292_v4 = vpop.f32.mrf.mxu0 }
 0x2c9   :  { %v601_v5 = vpop.f32.mrf.mxu0 }
 0x2cb   :  { %v1293_v6 = vpop.f32.mrf.mxu0 }
 0x2cc   :  { %v623_v7 = vpack.c.bf16 %v1293_v6, %v1292_v4  ;;  %v1430_v4 = vld [vmem:[%s1711_s5 + $0x70] sm:$0xff]   ;;  %v1432_v6 = vld [vmem:[%s1711_s5 + $0x60] sm:$0xff]  }
 0x2cd   :  { %v604_v8 = vpop.f32.mrf.mxu0 }
 0x2ce   :  { %v622_v9 = vpack.c.bf16 %v604_v8, %v601_v5  ;;  %1294 = vmatprep.subr.bf16.mxu1 %v623_v7  ;;  %v1431_v5 = vld [vmem:[%s1711_s5 + $0x68] sm:$0xff]  }
 0x2cf   :  { %1295 = vmatpush3.bf16.msra.mxu1 %v623_v7  ;;  %v1433_v7 = vld [vmem:[%s1711_s5 + $0x58] sm:$0xff]  }
 0x2d0   :  { %1296 = vmatprep.subr.bf16.mxu1 %v622_v9 }
 0x2d3   :  { %1297 = vmatpush3.bf16.msra.mxu1 %v622_v9 }
 0x2d4   :  { %1298 = vmatprep.subr.bf16.mxu1 %v621_v10 }
 0x2d7   :  { %1299 = vmatpush3.bf16.msra.mxu1 %v621_v10 }
 0x2d8   :  { %1300 = vmatprep.subr.bf16.mxu1 %v620_v11 }
 0x2db   :  { %1301 = vmatpush3.bf16.msra.mxu1 %v620_v11 }
 0x2dc   :  { %1302 = vmatprep.subr.bf16.mxu1 %v619_v12 }
 0x2df   :  { %1303 = vmatpush3.bf16.msra.mxu1 %v619_v12 }
 0x2e0   :  { %1304 = vmatprep.subr.bf16.mxu1 %v618_v13 }
 0x2e3   :  { %1305 = vmatpush3.bf16.msra.mxu1 %v618_v13  ;;  %v1434_v13 = vld [vmem:[%s1711_s5 + $0x50] sm:$0xff]  }
 0x2e4   :  { %1306 = vmatprep.subr.bf16.mxu1 %v617_v14 }
 0x2e7   :  { %1307 = vmatpush3.bf16.msra.mxu1 %v617_v14  ;;  %v1435_v14 = vld [vmem:[%s1711_s5 + $0x48] sm:$0xff]  }
 0x2e8   :  { %1308 = vmatprep.subr.bf16.mxu1 %v616_v15 }
 0x2eb   :  { %1309 = vmatpush3.bf16.msra.mxu1 %v616_v15  ;;  %v1436_v15 = vld [vmem:[%s1711_s5 + $0x40] sm:$0xff]  }
 0x2ec   :  { %1346 = vmatprep.subr.bf16.mxu1 %v1437_v16 }
 0x2ee   :  { %1311 = vmatmul.mubr.bf16.vlgmr.msra.gmra.mxu1 %v1551_v46  ;;  %v1421_v46 = vld [vmem:[%s1711_s5 + $0x38] sm:$0xff]  }
 0x2ef   :  { %1314 = vmatprep.mubr.bf16.mxu1 %v1556_v47  ;;  %1347 = vmatpush3.bf16.msra.mxu1 %v1421_v46  ;;  %v1422_v47 = vld [vmem:[%s1711_s5 + $0x30] sm:$0xff]   ;;  %v1072_v46 = vld [vmem:[%s1712_s6] ss:$0 sm:$0xff] }
 0x2f0   :  { %1348 = vmatprep.subr.bf16.mxu1 %v1437_v16 }
 0x2f3   :  { %1349 = vmatpush3.bf16.msra.mxu1 %v1422_v47 }
 0x2f4   :  { %1350 = vmatprep.subr.bf16.mxu1 %v1437_v16 }
 0x2f6   :  { %1315 = vmatmul.mubr.bf16.gmra.mxu1 %v1563_v48  ;;  %v1423_v48 = vld [vmem:[%s1711_s5 + $0x28] sm:$0xff]  }
 0x2f7   :  { %1318 = vmatprep.mubr.bf16.mxu1 %v1568_v49  ;;  %v1424_v49 = vld [vmem:[%s1711_s5 + $0x20] sm:$0xff]   ;;  %1351 = vmatpush3.bf16.msra.mxu1 %v1423_v48 }
 0x2f8   :  { %1352 = vmatprep.subr.bf16.mxu1 %v1437_v16 }
 0x2fb   :  { %1353 = vmatpush3.bf16.msra.mxu1 %v1424_v49 }
 0x2fc   :  { %1354 = vmatprep.subr.bf16.mxu1 %v1437_v16 }
 0x2fe   :  { %1319 = vmatmul.mubr.bf16.gmra.mxu1 %v1575_v50  ;;  %v1425_v50 = vld [vmem:[%s1711_s5 + $0x18] sm:$0xff]  }
 0x2ff   :  { %1322 = vmatprep.mubr.bf16.mxu1 %v1580_v51  ;;  %1355 = vmatpush3.bf16.msra.mxu1 %v1425_v50  ;;  %v1426_v51 = vld [vmem:[%s1711_s5 + $0x10] sm:$0xff]  }
 0x300   :  { %1356 = vmatprep.subr.bf16.mxu1 %v1437_v16 }
 0x303   :  { %1357 = vmatpush3.bf16.msra.mxu1 %v1426_v51 }
 0x304   :  { %1358 = vmatprep.subr.bf16.mxu1 %v1437_v16 }
 0x306   :  { %1323 = vmatmul.mubr.bf16.gmra.mxu1 %v1587_v52 }
 0x307   :  { %1362 = vmatprep.mubr.msk.bf16.mxu1 %vm1438_vm0, %v1437_v16  ;;  %1359 = vmatpush3.bf16.msra.mxu1 %v1427_v2 }
 0x308   :  { %1360 = vmatprep.subr.bf16.mxu1 %v1437_v16 }
 0x30b   :  { %1361 = vmatpush3.bf16.msra.mxu1 %v1428_v3 }
 0x3ae   :  { %v1312_v52 = vpop.f32.mrf.mxu1 }
 0x3af   :  { %v673_v60 = vadd.f32 %v1312_v52, %v1070_v30 }
 0x3b0   :  { %v664_v17 = vpop.f32.mrf.mxu1 }
 0x3b1   :  { %v665_v63 = vadd.f32 %v1070_v30, %v664_v17 }
 0x3b2   :  { %v1313_v18 = vpop.f32.mrf.mxu1 }
 0x3b3   :  { %v676_v57 = vadd.f32 %v1313_v18, %v1070_v30 }
 0x3b4   :  { %v667_v19 = vpop.f32.mrf.mxu1 }
 0x3b5   :  { %v728_v61 = vpack.c.bf16 %v676_v57, %v673_v60  ;;  %v668_v62 = vadd.f32 %v1070_v30, %v667_v19 }
 0x3b6   :  { %v1316_v20 = vpop.f32.mrf.mxu1 }
 0x3b7   :  { %v689_v53 = vadd.f32 %v1316_v20, %v1070_v30  ;;  %v727_v0 = vpack.c.bf16 %v668_v62, %v665_v63 }
 0x3b8   :  { %v680_v21 = vpop.f32.mrf.mxu1 }
 0x3b9   :  { %v681_v56 = vadd.f32 %v1070_v30, %v680_v21 }
 0x3ba   :  { %v1317_v22 = vpop.f32.mrf.mxu1 }
 0x3bb   :  { %v692_v44 = vadd.f32 %v1317_v22, %v1070_v30 }
 0x3bc   :  { %v683_v23 = vpop.f32.mrf.mxu1 }
 0x3bd   :  { %v730_v54 = vpack.c.bf16 %v692_v44, %v689_v53  ;;  %v684_v55 = vadd.f32 %v1070_v30, %v683_v23 }
 0x3be   :  { %v1320_v24 = vpop.f32.mrf.mxu1 }
 0x3bf   :  { %v705_v40 = vadd.f32 %v1320_v24, %v1070_v30  ;;  %v729_v59 = vpack.c.bf16 %v684_v55, %v681_v56 }
 0x3c0   :  { %v696_v25 = vpop.f32.mrf.mxu1 }
 0x3c1   :  { %v697_v43 = vadd.f32 %v1070_v30, %v696_v25 }
 0x3c2   :  { %v1321_v26 = vpop.f32.mrf.mxu1 }
 0x3c3   :  { %v708_v38 = vadd.f32 %v1321_v26, %v1070_v30 }
 0x3c4   :  { %v699_v27 = vpop.f32.mrf.mxu1 }
 0x3c5   :  { %v732_v41 = vpack.c.bf16 %v708_v38, %v705_v40  ;;  %v700_v42 = vadd.f32 %v1070_v30, %v699_v27 }
 0x3c6   :  { %v1324_v28 = vpop.f32.mrf.mxu1 }
 0x3c7   :  { %v721_v32 = vadd.f32 %v1324_v28, %v1070_v30  ;;  %v731_v45 = vpack.c.bf16 %v700_v42, %v697_v43 }
 0x3c8   :  { %v712_v29 = vpop.f32.mrf.mxu1 }
 0x3c9   :  { %v713_v37 = vadd.f32 %v1070_v30, %v712_v29 }
 0x3ca   :  { %v1325_v31 = vpop.f32.mrf.mxu1 }
 0x3cb   :  { %v724_v33 = vadd.f32 %v1325_v31, %v1070_v30 }
 0x3cc   :  { %v715_v34 = vpop.f32.mrf.mxu1 }
 0x3cd   :  { %v734_v35 = vpack.c.bf16 %v724_v33, %v721_v32  ;;  %v716_v36 = vadd.f32 %v1070_v30, %v715_v34 }
 0x3cf   :  { %1327 = vmatpush3.bf16.msra.mxu0 %v734_v35  ;;  %v733_v39 = vpack.c.bf16 %v716_v36, %v713_v37 }
 0x3d0   :  { %1328 = vmatprep.subr.bf16.mxu0 %v1437_v16 }
 0x3d3   :  { %1329 = vmatpush3.bf16.msra.mxu0 %v733_v39 }
 0x3d4   :  { %1330 = vmatprep.subr.bf16.mxu0 %v1437_v16 }
 0x3d7   :  { %1331 = vmatpush3.bf16.msra.mxu0 %v732_v41 }
 0x3d8   :  { %1332 = vmatprep.subr.bf16.mxu0 %v1437_v16 }
 0x3db   :  { %1333 = vmatpush3.bf16.msra.mxu0 %v731_v45 }
 0x3dc   :  { %1334 = vmatprep.subr.bf16.mxu0 %v1437_v16 }
 0x3df   :  { %1335 = vmatpush3.bf16.msra.mxu0 %v730_v54 }
 0x3e0   :  { %1336 = vmatprep.subr.bf16.mxu0 %v1437_v16 }
 0x3e3   :  { %1337 = vmatpush3.bf16.msra.mxu0 %v729_v59 }
 0x3e4   :  { %1338 = vmatprep.subr.bf16.mxu0 %v1437_v16 }
 0x3e7   :  { %1339 = vmatpush3.bf16.msra.mxu0 %v728_v61 }
 0x3e8   :  { %1340 = vmatprep.subr.bf16.mxu0 %v1437_v16 }
 0x3eb   :  { %1341 = vmatpush3.bf16.msra.mxu0 %v727_v0 }
 0x3ec   :  { %1366 = vmatprep.subr.bf16.mxu0 %v1437_v16 }
 0x3ee   :  { %1343 = vmatmul.mubr.bf16.vlgmr.msra.gmra.mxu0 %v1420_v1 }
 0x3ef   :  { %1382 = vmatprep.mubr.msk.bf16.mxu0 %vm1438_vm0, %v1437_v16  ;;  %1367 = vmatpush3.bf16.msra.mxu0 %v1429_v58 }
 0x3f0   :  { %1368 = vmatprep.subr.bf16.mxu0 %v1437_v16 }
 0x3f3   :  { %1369 = vmatpush3.bf16.msra.mxu0 %v1430_v4 }
 0x3f4   :  { %1370 = vmatprep.subr.bf16.mxu0 %v1437_v16 }
 0x3f7   :  { %1371 = vmatpush3.bf16.msra.mxu0 %v1431_v5 }
 0x3f8   :  { %1372 = vmatprep.subr.bf16.mxu0 %v1437_v16 }
 0x3fb   :  { %1373 = vmatpush3.bf16.msra.mxu0 %v1432_v6 }
 0x3fc   :  { %1374 = vmatprep.subr.bf16.mxu0 %v1437_v16 }
 0x3ff   :  { %1375 = vmatpush3.bf16.msra.mxu0 %v1433_v7 }
 0x400   :  { %1376 = vmatprep.subr.bf16.mxu0 %v1437_v16 }
 0x403   :  { %1377 = vmatpush3.bf16.msra.mxu0 %v1434_v13 }
 0x404   :  { %1378 = vmatprep.subr.bf16.mxu0 %v1437_v16 }
 0x407   :  { %1379 = vmatpush3.bf16.msra.mxu0 %v1435_v14 }
 0x408   :  { %1380 = vmatprep.subr.bf16.mxu0 %v1437_v16  ;;  %v1098_v16 = vld [vmem:[%s1712_s6 + $0x1] ss:$0 sm:$0xff] }
 0x40b   :  { %1381 = vmatpush3.bf16.msra.mxu0 %v1436_v15 }
 0x4ae   :  { %v777_v8 = vpop.f32.mrf.mxu0 }
 0x4b0   :  { %v1344_v9 = vpop.f32.mrf.mxu0 }
 0x4b2   :  { %v780_v10 = vpop.f32.mrf.mxu0 }
 0x4b3   :  { %v801_v11 = vpack.c.bf16 %v780_v10, %v777_v8 }
 0x4b4   :  { %v1345_v12 = vpop.f32.mrf.mxu0 }
 0x4b5   :  { %1363 = vmatmul.mubr.bf16.vlgmr.msra.gmra.mxu1 %v801_v11 }
 0x575   :  { %v890_v47 = vpop.f32.mrf.mxu1 }
 0x576   :  { %v891_v49 = vadd.f32 %v1072_v46, %v890_v47 }
 0x577   :  { %v1364_v48 = vpop.f32.mrf.mxu1 }
 0x578   :  { %v897_v17 = vmax.f32 %v891_v49, 0.0 }
 0x579   :  { %v893_v50 = vpop.f32.mrf.mxu1 }
 0x57a   :  { %v894_v51 = vadd.f32 %v1072_v46, %v893_v50 }
 0x57b   :  { %v1365_v52 = vpop.f32.mrf.mxu1 }
 0x57c   :  { %v898_v18 = vmax.f32 %v894_v51, 0.0 }
 0x57e   :  { %v918_v19 = vpack.c.bf16 %v898_v18, %v897_v17 }
 0x580   :  { %1383 = vmatmul.mubr.bf16.vlgmr.msra.gmra.mxu0 %v918_v19 }
 0x640   :  { %v1007_v20 = vpop.f32.mrf.mxu0 }
 0x641   :  { %v1008_v21 = vadd.f32 %v1098_v16, %v1007_v20 }
 0x642   :  { %v1384_v22 = vpop.f32.mrf.mxu0 }
 0x643   :  { %1014 = vst [vmem:[%s1713_s7] sm:$0xff] %v1008_v21 }
 0x644   :  { %v1010_v23 = vpop.f32.mrf.mxu0 }
 0x645   :  { %v1011_v24 = vadd.f32 %v1098_v16, %v1010_v23 }
 0x646   :  { %v1385_v25 = vpop.f32.mrf.mxu0 }
 0x647   :  { %1015 = vst [vmem:[%s1713_s7 + $0x8] sm:$0xff] %v1011_v24 }

</bundles_post_ra>
